<compile_context>
chip_gen: v5e
topology: v5e:2x2
jax: 0.10.0
libtpu: 0.0.40
codegen_flags: <defaults>
</compile_context>

<pallas_src>
import numpy as np
import jax
import jax.numpy as jnp
from jax.experimental import pallas as pl
from jax.experimental.pallas import tpu as pltpu


def _dft_matrix(n):
    k = np.arange(n)
    return np.exp(-2j * np.pi * np.outer(k, k) / n)          # (n, n) complex128


def _largest_group(batch, n_cols):
    """Largest divisor of `batch` such that group * n_cols <= 128 (one lane tile)."""
    cap = max(1, 128 // max(1, n_cols))
    for g in range(min(batch, cap), 0, -1):
        if batch % g == 0:
            return g
    return 1


def _row_tile(m):
    """Output-row tile: full rows for small/medium fields, else a divisor of m that is a multiple of 8."""
    if m <= 512:
        return m
    for t in range(256, 7, -8):
        if m % t == 0:
            return t
    return m


def _vmem_limit_bytes():
    try:
        cap = int(pltpu.get_tpu_info().vmem_capacity_bytes)
        if cap > 0:
            return cap - cap // 8            # leave ~12.5% headroom for compiler scratch / sems
    except Exception:
        pass
    return None                              # fall back to the compiler default


def _make_kernel(mxu_dtype, precision):
    """One grid step: Z[row_tile] = A_c[row_tile] @ X_group @ Bd_c  (3 + 3 Karatsuba MXU dots)."""

    def dot(a, b):
        return jnp.dot(a, b, preferred_element_type=jnp.float32, precision=precision)

    def kernel(xr_ref, xi_ref, a_ref, b_ref, or_ref, oi_ref):
        # Stage 1: T = A_c[rows] @ X        (tm, Mo) @ (Mo, L)
        xr = xr_ref[0, 0].astype(mxu_dtype)
        xi = xi_ref[0, 0].astype(mxu_dtype)
        xs = xr + xi                                   # Karatsuba sum operand: single cast + add
        p1 = dot(a_ref[0, 0], xr)                      # Ar @ Xr
        p2 = dot(a_ref[0, 1], xi)                      # Ai @ Xi
        p3 = dot(a_ref[0, 2], xs)                      # (Ar + Ai) @ (Xr + Xi)
        tr = (p1 - p2).astype(mxu_dtype)               # recombine in f32, carry in MXU dtype
        ti = (p3 - p1 - p2).astype(mxu_dtype)
        ts = tr + ti
        # Stage 2: Z = T @ Bd_c             (tm, L) @ (L, L), Bd block-diagonal per field
        q1 = dot(tr, b_ref[0, 0])
        q2 = dot(ti, b_ref[0, 1])
        q3 = dot(ts, b_ref[0, 2])
        or_ref[0, 0] = q1 - q2
        oi_ref[0, 0] = q3 - q1 - q2

    return kernel


class FresnelPropagatorPallas:
    """Pallas-TPU FresnelPropagator: out = crop(ifft2(fft2(pad(x)) * H)), x complex (B, 3, Mo, No)."""

    def __init__(self, input_shape, distance, discretization_size, wave_lengths,
                 mxu_dtype=jnp.bfloat16):
        B, C, Mo, No = input_shape
        wl = np.asarray(wave_lengths, dtype=np.float64).reshape(-1)
        assert C == wl.size == 3, "FresnelPropagator expects 3 wavelength channels"
        self.input_shape = tuple(input_shape)

        Mpad, Npad = Mo // 4, No // 4
        M, N = Mo + 2 * Mpad, No + 2 * Npad
        self.Mpad, self.Npad, self.M, self.N = Mpad, Npad, M, N

        # ---- host-side float64 precompute -------------------------------------------------
        # Separable transfer function: H_c[m, n] = u_c[m] * v_c[n]  (exactly rank-1).
        mc = np.fft.ifftshift(np.arange(M) - (M - 1.0) / 2) / (discretization_size * N)  # fx (rows)
        nc = np.fft.ifftshift(np.arange(N) - (N - 1.0) / 2) / (discretization_size * M)  # fy (cols)
        u = np.exp(-1j * np.pi * distance * wl[:, None] * mc[None, :] ** 2)              # (3, M)
        v = np.exp(-1j * np.pi * distance * wl[:, None] * nc[None, :] ** 2)              # (3, N)

        FM, FN = _dft_matrix(M), _dft_matrix(N)
        Fm_s = FM[:, Mpad:Mpad + Mo]               # forward DFT restricted to nonzero (unpadded) rows
        Fn_s = FN[Npad:Npad + No, :]
        Cm = np.conj(FM)[Mpad:Mpad + Mo, :]        # inverse DFT restricted to the cropped window
        Cn = np.conj(FN)[:, Npad:Npad + No]

        # Z_{b,c} = A_c @ X_{b,c} @ Bm_c  (ifft2 1/(M*N) normalization folded into Bm).
        A = np.einsum('rm,cm,mk->crk', Cm, u, Fm_s)                # (3, Mo, Mo)
        Bm = np.einsum('kn,cn,nl->ckl', Fn_s, v, Cn) / (M * N)     # (3, No, No)

        # Lane-batching: pack g fields per MXU call when No is lane-sparse (< 128).
        g = _largest_group(B, No)
        L = g * No
        Bd = np.zeros((3, L, L), dtype=np.complex128)
        for j in range(g):
            Bd[:, j * No:(j + 1) * No, j * No:(j + 1) * No] = Bm
        self.g, self.G, self.L = g, B // g, L

        # Row-slab tiling of the output rows for very large fields (VMEM headroom on v7x).
        self.tile_m = _row_tile(Mo)
        self.n_row_tiles = Mo // self.tile_m

        def karatsuba_stack(z):            # (3, R, S) complex -> (3, 3, R, S): [re, im, re+im]
            r, i = np.real(z), np.imag(z)
            return jnp.asarray(np.stack([r, i, r + i], axis=1), dtype=mxu_dtype)

        self.A = karatsuba_stack(A)        # (3, 3, Mo, Mo)
        self.Bd = karatsuba_stack(Bd)      # (3, 3, L,  L)

        full_f32 = np.dtype(mxu_dtype) == np.dtype(np.float32)
        precision = jax.lax.Precision.HIGHEST if full_f32 else None
        self._kernel = _make_kernel(mxu_dtype, precision)
        self._vmem_limit = _vmem_limit_bytes()
        self._forward_jit = jax.jit(self._forward)

    # ---------------------------------------------------------------------------------------
    def _forward(self, input_field):
        B, C, Mo, No = self.input_shape
        g, G, L = self.g, self.G, self.L
        tm, R = self.tile_m, self.n_row_tiles

        xr = jnp.real(input_field).astype(jnp.float32)
        xi = jnp.imag(input_field).astype(jnp.float32)

        if g > 1:
            # (B, C, Mo, No) -> (C, G, Mo, g*No): g fields side by side on the lane axis.
            def to_lanes(t):
                return (t.reshape(G, g, C, Mo, No)
                         .transpose(2, 0, 3, 1, 4)
                         .reshape(C, G, Mo, L))
            xr, xi = to_lanes(xr), to_lanes(xi)
            field_shape = (C, G, Mo, L)
            x_map = lambda c, i, r: (c, i, 0, 0)
            o_map = lambda c, i, r: (c, i, r, 0)
        else:
            # No data movement needed: express the (c, b) walk purely via the index maps.
            field_shape = (B, C, Mo, No)
            x_map = lambda c, i, r: (i, c, 0, 0)
            o_map = lambda c, i, r: (i, c, r, 0)

        in_specs = [
            pl.BlockSpec((1, 1, Mo, L), x_map),                            # x real
            pl.BlockSpec((1, 1, Mo, L), x_map),                            # x imag
            pl.BlockSpec((1, 3, tm, Mo), lambda c, i, r: (c, 0, r, 0)),    # A_c row slab (Karatsuba stack)
            pl.BlockSpec((1, 3, L, L), lambda c, i, r: (c, 0, 0, 0)),      # Bd_c (block-diag right factor)
        ]
        out_specs = [
            pl.BlockSpec((1, 1, tm, L), o_map),
            pl.BlockSpec((1, 1, tm, L), o_map),
        ]
        out_shape = (jax.ShapeDtypeStruct(field_shape, jnp.float32),
                     jax.ShapeDtypeStruct(field_shape, jnp.float32))

        flops = 2.0 * 3.0 * C * G * (Mo * Mo * L + Mo * L * L)             # 6 real MXU dots per group
        const_bytes = (self.A.size + self.Bd.size) * self.A.dtype.itemsize
        bytes_accessed = int(4 * B * C * Mo * No * 4 + const_bytes)

        zr, zi = pl.pallas_call(
            self._kernel,
            grid=(C, G, R),
            in_specs=in_specs,
            out_specs=out_specs,
            out_shape=out_shape,
            compiler_params=pltpu.CompilerParams(
                dimension_semantics=("parallel", "parallel", "parallel"),
                vmem_limit_bytes=self._vmem_limit),
            cost_estimate=pl.CostEstimate(flops=int(flops), transcendentals=0,
                                          bytes_accessed=bytes_accessed),
        )(xr, xi, self.A, self.Bd)

        if g > 1:
            def from_lanes(t):
                return (t.reshape(C, G, Mo, g, No)
                         .transpose(1, 3, 0, 2, 4)
                         .reshape(B, C, Mo, No))
            zr, zi = from_lanes(zr), from_lanes(zi)
        return jax.lax.complex(zr, zi)

    def __call__(self, input_field):
        assert tuple(input_field.shape) == self.input_shape, (
            f"expected {self.input_shape}, got {tuple(input_field.shape)}")
        return self._forward_jit(input_field)


if __name__ == "__main__":
    # Small deterministic configuration (C must be 3: wave_lengths.view(1, 3, 1, 1) in the spec).
    B, C, Mo, No = 2, 3, 16, 16
    distance = 2e-3
    discretization_size = 8e-6
    wave_lengths = np.array([640e-9, 550e-9, 450e-9], dtype=np.float64)

    prop = FresnelPropagatorPallas((B, C, Mo, No), distance, discretization_size, wave_lengths)

    key = jax.random.PRNGKey(0)
    kr, ki = jax.random.split(key)
    x_re = jax.random.normal(kr, (B, C, Mo, No), dtype=jnp.float32)
    x_im = jax.random.normal(ki, (B, C, Mo, No), dtype=jnp.float32)
    input_field = jax.lax.complex(x_re, x_im)                     # complex64, NCHW

    out = jax.block_until_ready(prop(input_field))
    assert out.shape == (B, C, Mo, No) and out.dtype == jnp.complex64

    # Reference: mirror the PyTorch module exactly (dense H, pad, fft2, multiply, ifft2, crop),
    # in float64 NumPy, fully independent of the kernel's rank-1/precombined factorization.
    Mpad, Npad = Mo // 4, No // 4
    M, N = Mo + 2 * Mpad, No + 2 * Npad
    xg = (np.arange(M) - (M - 1.0) / 2) * 1.0
    yg = (np.arange(N) - (N - 1.0) / 2) * 1.0
    xx, yy = np.meshgrid(xg, yg, indexing="ij")
    fx = np.fft.ifftshift(xx / (discretization_size * N))
    fy = np.fft.ifftshift(yy / (discretization_size * M))
    phi = -np.pi * distance * wave_lengths.reshape(3, 1, 1) * (fx ** 2 + fy ** 2)[None]
    H = np.exp(1j * phi)[None]                                    # (1, 3, M, N)
    x_np = np.asarray(input_field).astype(np.complex128)
    xp = np.pad(x_np, ((0, 0), (0, 0), (Mpad, Mpad), (Npad, Npad)))
    ref = np.fft.ifft2(np.fft.fft2(xp) * H)[:, :, Mpad:-Mpad, Npad:-Npad]

    out_np = np.asarray(out)
    rel_l2 = np.linalg.norm(out_np - ref) / np.linalg.norm(ref)
    # bf16 MXU operands with f32 accumulation; same budget the previous version validated.
    assert rel_l2 < 2.5e-2, f"relative L2 error too high: {rel_l2}"
    np.testing.assert_allclose(out_np, ref, rtol=5e-2, atol=5e-2)

    print("KERNEL_OK")
</pallas_src>

<mosaic_0001>
module attributes {stable_mosaic.version = 11 : i64} {
  func.func @kernel(%arg0: i32, %arg1: i32, %arg2: i32, %arg3: memref<1x1x16x32xf32, #tpu.memory_space<vmem>>, %arg4: memref<1x1x16x32xf32, #tpu.memory_space<vmem>>, %arg5: memref<1x3x16x16xbf16, #tpu.memory_space<vmem>>, %arg6: memref<1x3x32x32xbf16, #tpu.memory_space<vmem>>, %arg7: memref<1x1x16x32xf32, #tpu.memory_space<vmem>>, %arg8: memref<1x1x16x32xf32, #tpu.memory_space<vmem>>) attributes {dimension_semantics = [#tpu.dimension_semantics<parallel>, #tpu.dimension_semantics<parallel>, #tpu.dimension_semantics<parallel>], iteration_bounds = array<i64: 3, 1, 1>, scalar_prefetch = 0 : i64, scratch_operands = 0 : i64, tpu.core_type = #tpu.core_type<tc>, window_params = [{transform_indices = @transform_0, window_bounds = array<i64: 1, 1, 16, 32>}, {transform_indices = @transform_1, window_bounds = array<i64: 1, 1, 16, 32>}, {transform_indices = @transform_2, window_bounds = array<i64: 1, 3, 16, 16>}, {transform_indices = @transform_3, window_bounds = array<i64: 1, 3, 32, 32>}, {transform_indices = @transform_4, window_bounds = array<i64: 1, 1, 16, 32>}, {transform_indices = @transform_5, window_bounds = array<i64: 1, 1, 16, 32>}]} {
    %c0 = arith.constant 0 : index
    %c0_0 = arith.constant 0 : index
    %c0_1 = arith.constant 0 : index
    %c0_2 = arith.constant 0 : index
    %0 = vector.load %arg3[%c0, %c0_0, %c0_1, %c0_2] : memref<1x1x16x32xf32, #tpu.memory_space<vmem>>, vector<1x1x16x32xf32>
    %1 = vector.shape_cast %0 : vector<1x1x16x32xf32> to vector<16x32xf32>
    %2 = arith.truncf %1 : vector<16x32xf32> to vector<16x32xbf16>
    %c0_3 = arith.constant 0 : index
    %c0_4 = arith.constant 0 : index
    %c0_5 = arith.constant 0 : index
    %c0_6 = arith.constant 0 : index
    %3 = vector.load %arg4[%c0_3, %c0_4, %c0_5, %c0_6] : memref<1x1x16x32xf32, #tpu.memory_space<vmem>>, vector<1x1x16x32xf32>
    %4 = vector.shape_cast %3 : vector<1x1x16x32xf32> to vector<16x32xf32>
    %5 = arith.truncf %4 : vector<16x32xf32> to vector<16x32xbf16>
    %6 = arith.addf %2, %5 : vector<16x32xbf16>
    %c0_7 = arith.constant 0 : index
    %c0_8 = arith.constant 0 : index
    %c0_9 = arith.constant 0 : index
    %c0_10 = arith.constant 0 : index
    %7 = vector.load %arg5[%c0_7, %c0_8, %c0_9, %c0_10] : memref<1x3x16x16xbf16, #tpu.memory_space<vmem>>, vector<1x1x16x16xbf16>
    %8 = vector.shape_cast %7 : vector<1x1x16x16xbf16> to vector<16x16xbf16>
    %cst = arith.constant dense<0.000000e+00> : vector<16x32xf32>
    %9 = tpu.matmul %8, %2, %cst {dimension_numbers = #tpu.dot_dimension_numbers<[1], [0], [0], [1], [0, 0, 1, 1], [], []>} : vector<16x16xbf16>, vector<16x32xbf16>, vector<16x32xf32> -> vector<16x32xf32>
    %c0_11 = arith.constant 0 : index
    %c1 = arith.constant 1 : index
    %c0_12 = arith.constant 0 : index
    %c0_13 = arith.constant 0 : index
    %10 = vector.load %arg5[%c0_11, %c1, %c0_12, %c0_13] : memref<1x3x16x16xbf16, #tpu.memory_space<vmem>>, vector<1x1x16x16xbf16>
    %11 = vector.shape_cast %10 : vector<1x1x16x16xbf16> to vector<16x16xbf16>
    %cst_14 = arith.constant dense<0.000000e+00> : vector<16x32xf32>
    %12 = tpu.matmul %11, %5, %cst_14 {dimension_numbers = #tpu.dot_dimension_numbers<[1], [0], [0], [1], [0, 0, 1, 1], [], []>} : vector<16x16xbf16>, vector<16x32xbf16>, vector<16x32xf32> -> vector<16x32xf32>
    %c0_15 = arith.constant 0 : index
    %c2 = arith.constant 2 : index
    %c0_16 = arith.constant 0 : index
    %c0_17 = arith.constant 0 : index
    %13 = vector.load %arg5[%c0_15, %c2, %c0_16, %c0_17] : memref<1x3x16x16xbf16, #tpu.memory_space<vmem>>, vector<1x1x16x16xbf16>
    %14 = vector.shape_cast %13 : vector<1x1x16x16xbf16> to vector<16x16xbf16>
    %cst_18 = arith.constant dense<0.000000e+00> : vector<16x32xf32>
    %15 = tpu.matmul %14, %6, %cst_18 {dimension_numbers = #tpu.dot_dimension_numbers<[1], [0], [0], [1], [0, 0, 1, 1], [], []>} : vector<16x16xbf16>, vector<16x32xbf16>, vector<16x32xf32> -> vector<16x32xf32>
    %16 = arith.subf %9, %12 : vector<16x32xf32>
    %17 = arith.truncf %16 : vector<16x32xf32> to vector<16x32xbf16>
    %18 = arith.subf %15, %9 : vector<16x32xf32>
    %19 = arith.subf %18, %12 : vector<16x32xf32>
    %20 = arith.truncf %19 : vector<16x32xf32> to vector<16x32xbf16>
    %21 = arith.addf %17, %20 : vector<16x32xbf16>
    %c0_19 = arith.constant 0 : index
    %c0_20 = arith.constant 0 : index
    %c0_21 = arith.constant 0 : index
    %c0_22 = arith.constant 0 : index
    %22 = vector.load %arg6[%c0_19, %c0_20, %c0_21, %c0_22] : memref<1x3x32x32xbf16, #tpu.memory_space<vmem>>, vector<1x1x32x32xbf16>
    %23 = vector.shape_cast %22 : vector<1x1x32x32xbf16> to vector<32x32xbf16>
    %cst_23 = arith.constant dense<0.000000e+00> : vector<16x32xf32>
    %24 = tpu.matmul %17, %23, %cst_23 {dimension_numbers = #tpu.dot_dimension_numbers<[1], [0], [0], [1], [0, 0, 1, 1], [], []>} : vector<16x32xbf16>, vector<32x32xbf16>, vector<16x32xf32> -> vector<16x32xf32>
    %c0_24 = arith.constant 0 : index
    %c1_25 = arith.constant 1 : index
    %c0_26 = arith.constant 0 : index
    %c0_27 = arith.constant 0 : index
    %25 = vector.load %arg6[%c0_24, %c1_25, %c0_26, %c0_27] : memref<1x3x32x32xbf16, #tpu.memory_space<vmem>>, vector<1x1x32x32xbf16>
    %26 = vector.shape_cast %25 : vector<1x1x32x32xbf16> to vector<32x32xbf16>
    %cst_28 = arith.constant dense<0.000000e+00> : vector<16x32xf32>
    %27 = tpu.matmul %20, %26, %cst_28 {dimension_numbers = #tpu.dot_dimension_numbers<[1], [0], [0], [1], [0, 0, 1, 1], [], []>} : vector<16x32xbf16>, vector<32x32xbf16>, vector<16x32xf32> -> vector<16x32xf32>
    %c0_29 = arith.constant 0 : index
    %c2_30 = arith.constant 2 : index
    %c0_31 = arith.constant 0 : index
    %c0_32 = arith.constant 0 : index
    %28 = vector.load %arg6[%c0_29, %c2_30, %c0_31, %c0_32] : memref<1x3x32x32xbf16, #tpu.memory_space<vmem>>, vector<1x1x32x32xbf16>
    %29 = vector.shape_cast %28 : vector<1x1x32x32xbf16> to vector<32x32xbf16>
    %cst_33 = arith.constant dense<0.000000e+00> : vector<16x32xf32>
    %30 = tpu.matmul %21, %29, %cst_33 {dimension_numbers = #tpu.dot_dimension_numbers<[1], [0], [0], [1], [0, 0, 1, 1], [], []>} : vector<16x32xbf16>, vector<32x32xbf16>, vector<16x32xf32> -> vector<16x32xf32>
    %31 = arith.subf %24, %27 : vector<16x32xf32>
    %c0_34 = arith.constant 0 : index
    %c0_35 = arith.constant 0 : index
    %c0_36 = arith.constant 0 : index
    %c0_37 = arith.constant 0 : index
    %32 = vector.load %arg7[%c0_34, %c0_35, %c0_36, %c0_37] : memref<1x1x16x32xf32, #tpu.memory_space<vmem>>, vector<1x1x16x32xf32>
    %33 = vector.shape_cast %32 : vector<1x1x16x32xf32> to vector<16x32xf32>
    %34 = vector.shape_cast %31 : vector<16x32xf32> to vector<1x1x16x32xf32>
    tpu.vector_store %arg7[%c0_34, %c0_35, %c0_36, %c0_37], %34 {strides = array<i32>} : memref<1x1x16x32xf32, #tpu.memory_space<vmem>>, vector<1x1x16x32xf32>,
    %35 = arith.subf %30, %24 : vector<16x32xf32>
    %36 = arith.subf %35, %27 : vector<16x32xf32>
    %c0_38 = arith.constant 0 : index
    %c0_39 = arith.constant 0 : index
    %c0_40 = arith.constant 0 : index
    %c0_41 = arith.constant 0 : index
    %37 = vector.load %arg8[%c0_38, %c0_39, %c0_40, %c0_41] : memref<1x1x16x32xf32, #tpu.memory_space<vmem>>, vector<1x1x16x32xf32>
    %38 = vector.shape_cast %37 : vector<1x1x16x32xf32> to vector<16x32xf32>
    %39 = vector.shape_cast %36 : vector<16x32xf32> to vector<1x1x16x32xf32>
    tpu.vector_store %arg8[%c0_38, %c0_39, %c0_40, %c0_41], %39 {strides = array<i32>} : memref<1x1x16x32xf32, #tpu.memory_space<vmem>>, vector<1x1x16x32xf32>,
    return
  }
  func.func @transform_0(%arg0: i32, %arg1: i32, %arg2: i32) -> (i32, i32, i32, i32) {
    %c0_i32 = arith.constant 0 : i32
    %c0_i32_0 = arith.constant 0 : i32
    %c0_i32_1 = arith.constant 0 : i32
    return %arg0, %arg1, %c0_i32, %c0_i32_0 : i32, i32, i32, i32
  }
  func.func @transform_1(%arg0: i32, %arg1: i32, %arg2: i32) -> (i32, i32, i32, i32) {
    %c0_i32 = arith.constant 0 : i32
    %c0_i32_0 = arith.constant 0 : i32
    %c0_i32_1 = arith.constant 0 : i32
    return %arg0, %arg1, %c0_i32, %c0_i32_0 : i32, i32, i32, i32
  }
  func.func @transform_2(%arg0: i32, %arg1: i32, %arg2: i32) -> (i32, i32, i32, i32) {
    %c0_i32 = arith.constant 0 : i32
    %c0_i32_0 = arith.constant 0 : i32
    %c0_i32_1 = arith.constant 0 : i32
    return %arg0, %c0_i32, %arg2, %c0_i32_0 : i32, i32, i32, i32
  }
  func.func @transform_3(%arg0: i32, %arg1: i32, %arg2: i32) -> (i32, i32, i32, i32) {
    %c0_i32 = arith.constant 0 : i32
    %c0_i32_0 = arith.constant 0 : i32
    %c0_i32_1 = arith.constant 0 : i32
    %c0_i32_2 = arith.constant 0 : i32
    return %arg0, %c0_i32, %c0_i32_0, %c0_i32_1 : i32, i32, i32, i32
  }
  func.func @transform_4(%arg0: i32, %arg1: i32, %arg2: i32) -> (i32, i32, i32, i32) {
    %c0_i32 = arith.constant 0 : i32
    %c0_i32_0 = arith.constant 0 : i32
    return %arg0, %arg1, %arg2, %c0_i32 : i32, i32, i32, i32
  }
  func.func @transform_5(%arg0: i32, %arg1: i32, %arg2: i32) -> (i32, i32, i32, i32) {
    %c0_i32 = arith.constant 0 : i32
    %c0_i32_0 = arith.constant 0 : i32
    return %arg0, %arg1, %arg2, %c0_i32 : i32, i32, i32, i32
  }
}

</mosaic_0001>

<bundles_post_ra>
// kernel: custom-call
= control target key start
LH: loop header
LB: loop body
LE: loop exit
PB: predicated region body
PF: predicated region fallthrough
CT: control target
= control target key end

     0   :  { %2 = vsyncpa [#allocation0], 0  ;;  %s55_s0 = inlined_call_operand.hbm [shape: c64[2,3,16,16], index: 0, kind: input, shape index: {}]   ;;  %s56_s1 = inlined_call_operand.vmem [shape: f32[2,3,16,16], index: 1, kind: output, shape index: {}]  }
   0x1   :  { %s4_s8 = sshll.u32 %s55_s0, 4  ;;  %s6_s11 = sshll.u32 %s56_s1, 4  ;;  %s5_s8 = int_to_ptr.hbm [resolvable:$true] %s4_s8  ;;  %s7_s11 = int_to_ptr.vmem [resolvable:$true] %s6_s11 }
   0x2   :  { %9 = dma.hbm_to_vmem [thread:$0]  %s5_s8, 1536, %s7_s11, [#allocation0] }
   0x3   :  { %37 = dma.done.wait [#allocation0], 1536  }
   0x4   :  { %38 = vsyncadd [#allocation0], 4294965760 }
   0x5   :  { %12 = vsyncpa [#allocation0], 1 }

// kernel: custom-call.1
= control target key start
LH: loop header
LB: loop body
LE: loop exit
PB: predicated region body
PF: predicated region fallthrough
CT: control target
= control target key end

     0   :  { %s56_s0 = inlined_call_operand.hbm [shape: c64[2,3,16,16], index: 0, kind: input, shape index: {}]   ;;  %s57_s1 = inlined_call_operand.vmem [shape: f32[2,3,16,16], index: 1, kind: output, shape index: {}]  }
   0x1   :  { %s2_s8 = scalar_lea.hbm %s56_s0, 96 }
   0x2   :  { %3 = vsyncpa [#allocation0], 0  ;;  %s5_s9 = sshll.u32 %s2_s8, 4  ;;  %s7_s12 = sshll.u32 %s57_s1, 4  ;;  %s6_s9 = int_to_ptr.hbm [resolvable:$true] %s5_s9  ;;  %s8_s12 = int_to_ptr.vmem [resolvable:$true] %s7_s12 }
   0x3   :  { %10 = dma.hbm_to_vmem [thread:$0]  %s6_s9, 1536, %s8_s12, [#allocation0] }
   0x4   :  { %38 = dma.done.wait [#allocation0], 1536  }
   0x5   :  { %39 = vsyncadd [#allocation0], 4294965760 }
   0x6   :  { %13 = vsyncpa [#allocation0], 1 }

// kernel: custom-call.2
= control target key start
LH: loop header
LB: loop body
LE: loop exit
PB: predicated region body
PF: predicated region fallthrough
CT: control target
= control target key end

     0   :  { %s105_s0 = inlined_call_operand.vmem [shape: f32[2,3,16,16], index: 0, kind: input, shape index: {}]   ;;  %s106_s1 = inlined_call_operand.vmem [shape: f32[2,3,16,16], index: 1, kind: input, shape index: {}]   ;;  %s107_s2 = inlined_call_operand.hbm [shape: c64[2,3,16,16], index: 2, kind: output, shape index: {}]  }
   0x1   :  { %s3_s11 = scalar_lea.hbm %s107_s2, 96 }
   0x2   :  { %4 = vsyncpa [#allocation0], 0  ;;  %s6_s14 = sshll.u32 %s105_s0, 4  ;;  %s8_s17 = sshll.u32 %s107_s2, 4  ;;  %s7_s14 = int_to_ptr.vmem [resolvable:$true] %s6_s14  ;;  %s9_s17 = int_to_ptr.hbm [resolvable:$true] %s8_s17 }
   0x3   :  { %11 = dma.vmem_to_hbm [thread:$0]  %s7_s14, 1536, %s9_s17, [#allocation0] }
   0x4   :  { %74 = dma.done.wait [#allocation0], 1536  }
   0x5   :  { %75 = vsyncadd [#allocation0], 4294965760 }
   0x6   :  { %14 = vsyncpa [#allocation0], 1 }
   0x7   :  { %15 = vsyncpa [#allocation1], 0  ;;  %s17_s20 = sshll.u32 %s106_s1, 4  ;;  %s19_s21 = sshll.u32 %s3_s11, 4  ;;  %s18_s20 = int_to_ptr.vmem [resolvable:$true] %s17_s20  ;;  %s20_s21 = int_to_ptr.hbm [resolvable:$true] %s19_s21 }
   0x8   :  { %22 = dma.vmem_to_hbm [thread:$0]  %s18_s20, 1536, %s20_s21, [#allocation1] }
   0x9   :  { %76 = dma.done.wait [#allocation1], 1536  }
   0xa   :  { %77 = vsyncadd [#allocation1], 4294965760 }
   0xb   :  { %25 = vsyncpa [#allocation1], 1 }

// kernel: _forward.1
= control target key start
LH: loop header
LB: loop body
LE: loop exit
PB: predicated region body
PF: predicated region fallthrough
CT: control target
= control target key end

     0   :  { %s1035_s18 = smov 0   ;;  %s1037_s19 = smov 0   ;;  %s1098_s0 = inlined_call_operand.vmem [shape: f32[3,1,16,32], index: 0, kind: input, shape index: {}]   ;;  %s1099_s1 = inlined_call_operand.vmem [shape: f32[3,1,16,32], index: 1, kind: input, shape index: {}]   ;;  %s1100_s2 = inlined_call_operand.vmem [shape: bf16[3,3,16,16], index: 2, kind: input, shape index: {}]   ;;  %s1101_s3 = inlined_call_operand.vmem [shape: bf16[3,3,32,32], index: 3, kind: input, shape index: {}]   ;;  %s1102_s4 = inlined_call_operand.vmem [shape: f32[3,1,16,32], index: 4, kind: output, shape index: {0}]   ;;  %s1103_s5 = inlined_call_operand.vmem [shape: f32[3,1,16,32], index: 5, kind: output, shape index: {1}]  }
   0x1   :  { %s1039_s20 = smov 0  }
   0x2 LB: > { %s35_s21 = sadd.s32 1, %s999_s19  ;;  %p875_p0 = scmp.ge.s32.totalorder %s1003_s20, 1  ;;  %s1003_s20 = sphi %s1039_s20, %s16_s20   ;;  %s999_s19 = sphi %s1037_s19, %s1105_s19   ;;  %s995_s18 = sphi %s1035_s18, %s1104_s18  }
   0x3   : > { %p37_p1 = scmp.ge.s32.totalorder %s35_s21, 3  ;;  %p266_p2 = scmp.lt.s32.totalorder %s1003_s20, 4 }
   0x5   : > { %s1107_s21 = smov (%p37_p1, %s35_s21), 0  ;;  %p267_p3 = pnand %p875_p0, %p266_p2 }
   0x6   : > { %p342_p4 = scmp.lt.s32.totalorder (!%p267_p3), %s995_s18, 2 }
   0x7   : > { %270 = sbr.rel (%p267_p3) target bundleno = 319 (0x13f), region = 36 }
   0xc   : > { %s1109_s18 = smov (!%p342_p4, %s995_s18), 2  ;;  %vm432_vm0 = vcmask 130048   ;;  %vm544_vm1 = vcmask 261120  }
   0xd   : > { %s1056_s22 = sshll.u32 %s1109_s18, 4  ;;  %s955_s29 = smul.u32 24, %s1109_s18 }
   0xe   : > { %s350_s25 = scalar_lea.vmem %s1098_s0, %s1056_s22  ;;  %s359_s28 = scalar_lea.vmem %s1099_s1, %s1056_s22 }
   0xf   : > { %v404_v0 = vld [vmem:[%s350_s25] sm:$0xff]  ;;  %v405_v1 = vld [vmem:[%s350_s25 + $0x8] sm:$0xff]  ;;  %s368_s7 = scalar_lea.vmem %s1100_s2, %s955_s29  ;;  %s956_s8 = smul.u32 48, %s1109_s18 }
  0x10   : > { %v408_v2 = vld [vmem:[%s359_s28] sm:$0xff]  ;;  %v406_v3 = vpack.c.bf16 %v404_v0, %v404_v0  ;;  %v407_v4 = vpack.c.bf16 %v405_v1, %v405_v1  ;;  %v409_v5 = vld [vmem:[%s359_s28 + $0x8] sm:$0xff]  ;;  %v948_v23 = vld [vmem:[%s368_s7 + $0x10] sm:$0xff]  ;;  %s387_s14 = scalar_lea.vmem %s1102_s4, %s1056_s22  ;;  %s401_s17 = scalar_lea.vmem %s1103_s5, %s1056_s22 }
  0x11   : > { %v410_v6 = vpack.c.bf16 %v408_v2, %v408_v2  ;;  %v411_v7 = vpack.c.bf16 %v409_v5, %v409_v5  ;;  %v946_v20 = vld [vmem:[%s368_s7] sm:$0xff]  ;;  %v947_v21 = vld [vmem:[%s368_s7 + $0x8] sm:$0xff]  ;;  %s374_s11 = scalar_lea.vmem %s1101_s3, %s956_s8 }
  0x12   : > { %v428_v8 = vunpack.c.l.b16 %v406_v3  ;;  %v429_v9 = vunpack.c.l.b16 %v407_v4  ;;  %v412_v11 = vunpack.c.l.bf16 %v406_v3  ;;  %v413_v13 = vunpack.c.l.bf16 %v407_v4  ;;  %v950_v24 = vld [vmem:[%s374_s11 + $0x8] sm:$0xff]  ;;  %v949_v25 = vld [vmem:[%s374_s11] sm:$0xff]  ;;  %v952_v27 = vld [vmem:[%s374_s11 + $0x18] sm:$0xff] }
  0x13   : > { %v460_v10 = vunpack.c.l.b16 %v410_v6  ;;  %v461_v12 = vunpack.c.l.b16 %v411_v7  ;;  %v414_v14 = vunpack.c.l.bf16 %v410_v6  ;;  %v415_v15 = vunpack.c.l.bf16 %v411_v7  ;;  %554 = vmatpush.bf16.msra.mxu3 %v950_v24  ;;  %v954_v26 = vld [vmem:[%s374_s11 + $0x28] sm:$0xff]  ;;  %v951_v28 = vld [vmem:[%s374_s11 + $0x10] sm:$0xff]  ;;  %v953_v29 = vld [vmem:[%s374_s11 + $0x20] sm:$0xff] }
  0x14   : > { %v430_v16 = vpack.c.b16 %v429_v9, %v428_v8 }
  0x15   : > { %v462_v17 = vpack.c.b16 %v461_v12, %v460_v10  ;;  %v416_v18 = vadd.f32 %v414_v14, %v412_v11  ;;  %v417_v19 = vadd.f32 %v415_v15, %v413_v13 }
  0x16   : > { %443 = vmatpush.bf16.msra.mxu0 %v430_v16 }
  0x17   : > { %474 = vmatpush.bf16.msra.mxu1 %v462_v17  ;;  %v418_v22 = vpack.c.bf16 %v417_v19, %v416_v18  ;;  %555 = vmatpush.bf16.msra.mxu3 %v949_v25 }
  0x19   : > { %499 = vmatpush.bf16.msra.mxu2 %v418_v22  ;;  %890 = vmatmul.msk.bf16.vlgmr.msra.gmra.mxu0 %vm432_vm0, %v946_v20 }
  0x1a   : > { %897 = vmatmul.msk.bf16.vlgmr.msra.gmra.mxu1 %vm432_vm0, %v947_v21  ;;  %593 = vmatpush.bf16.msrb.mxu0 %v952_v27 }
  0x1b   : > { %627 = vmatpush.bf16.msrb.mxu1 %v954_v26 }
  0x1c   : > { %904 = vmatmul.msk.bf16.vlgmr.msra.gmra.mxu2 %vm432_vm0, %v948_v23 }
  0x1e   : > { %594 = vmatpush.bf16.msrb.mxu0 %v951_v28 }
  0x1f   : > { %628 = vmatpush.bf16.msrb.mxu1 %v953_v29 }
  0x96   : > { %v445_v30 = vpop.f32.mrf.mxu0 }
  0x97   : > { %v476_v31 = vpop.f32.mrf.mxu1 }
  0x98   : > { %v506_v32 = vsub.f32 %v445_v30, %v476_v31 }
  0x9a   : > { %v508_v36 = vpack.c.bf16 %v506_v32, %v506_v32 }
  0x9c   : > { %v529_v40 = vunpack.c.l.b16 %v508_v36  ;;  %v516_v50 = vunpack.c.l.bf16 %v508_v36 }
  0x9e   : > { %v447_v33 = vpop.f32.mrf.mxu0 }
  0x9f   : > { %v478_v34 = vpop.f32.mrf.mxu1  ;;  %v501_v35 = vpop.f32.mrf.mxu2 }
  0xa0   : > { %v507_v37 = vsub.f32 %v447_v33, %v478_v34  ;;  %v510_v38 = vsub.f32 %v501_v35, %v445_v30 }
  0xa2   : > { %v509_v39 = vpack.c.bf16 %v507_v37, %v507_v37  ;;  %v512_v42 = vsub.f32 %v510_v38, %v476_v31 }
  0xa4   : > { %v530_v41 = vunpack.c.l.b16 %v509_v39  ;;  %v514_v45 = vpack.c.bf16 %v512_v42, %v512_v42  ;;  %v517_v51 = vunpack.c.l.bf16 %v509_v39 }
  0xa6   : > { %v531_v43 = vpack.c.b16 %v530_v41, %v529_v40  ;;  %v518_v48 = vunpack.c.l.bf16 %v514_v45  ;;  %v569_v52 = vunpack.c.l.b16 %v514_v45 }
  0xa7   : > { %v503_v44 = vpop.f32.mrf.mxu2 }
  0xa8   : > { %v511_v46 = vsub.f32 %v503_v44, %v447_v33  ;;  %913 = vmatmul.msk.bf16.vlgmr.msra.gmra.mxu3 %vm544_vm1, %v531_v43  ;;  %v520_v55 = vadd.f32 %v518_v48, %v516_v50 }
  0xaa   : > { %v513_v47 = vsub.f32 %v511_v46, %v478_v34 }
  0xac   : > { %v515_v49 = vpack.c.bf16 %v513_v47, %v513_v47 }
  0xae   : > { %v519_v53 = vunpack.c.l.bf16 %v515_v49  ;;  %v570_v54 = vunpack.c.l.b16 %v515_v49 }
  0xb0   : > { %v521_v56 = vadd.f32 %v519_v53, %v517_v51  ;;  %v571_v57 = vpack.c.b16 %v570_v54, %v569_v52 }
  0xb2   : > { %926 = vmatmul.msk.bf16.vlgmr.msrb.gmra.mxu0 %vm544_vm1, %v571_v57  ;;  %v522_v58 = vpack.c.bf16 %v521_v56, %v520_v55 }
  0xb4   : > { %939 = vmatmul.msk.bf16.vlgmr.msrb.gmra.mxu1 %vm544_vm1, %v522_v58 }
 0x12b   : > { %v557_v59 = vpop.f32.mrf.mxu3 }
 0x12f   : > { %v596_v60 = vpop.f32.mrf.mxu0 }
 0x130   : > { %v635_v61 = vsub.f32 %v557_v59, %v596_v60 }
 0x131   : > { %v630_v62 = vpop.f32.mrf.mxu1 }
 0x132   : > { %637 = vst.msk [vmem:[%s387_s14] sm:$0xff] %vm544_vm1, %v635_v61  ;;  %v639_v63 = vsub.f32 %v630_v62, %v557_v59 }
 0x133   : > { %v559_v1 = vpop.f32.mrf.mxu3 }
 0x134   : > { %v641_v0 = vsub.f32 %v639_v63, %v596_v60 }
 0x136   : > { %643 = vst.msk [vmem:[%s401_s17] sm:$0xff] %vm544_vm1, %v641_v0 }
 0x137   : > { %v598_v2 = vpop.f32.mrf.mxu0 }
 0x138   : > { %v636_v3 = vsub.f32 %v559_v1, %v598_v2 }
 0x139   : > { %v632_v4 = vpop.f32.mrf.mxu1 }
 0x13a   : > { %638 = vst.msk [vmem:[%s387_s14 + $0x8] sm:$0xff] %vm544_vm1, %v636_v3  ;;  %v640_v5 = vsub.f32 %v632_v4, %v559_v1 }
 0x13c   : > { %v642_v6 = vsub.f32 %v640_v5, %v598_v2 }
 0x13e   : > { %644 = vst.msk [vmem:[%s401_s17 + $0x8] sm:$0xff] %vm544_vm1, %v642_v6 }
 0x13f PF: > { %s16_s20 = sadd.s32 1, %s1003_s20   ;;  %s1104_s18 = smov %s999_s19 }
 0x140   : > { %p13_p5 = scmp.ge.s32.totalorder %s16_s20, 5   ;;  %s1105_s19 = smov %s1107_s21 }
 0x142   :  { %15 = sbr.rel (!%p13_p5) target bundleno = 2 (0x2), region = 91 }

</bundles_post_ra>
